<compile_context>
chip_gen: v7x
topology: tpu7x:2x2x1
jax: 0.10.0
libtpu: 0.0.40
codegen_flags: <defaults>
</compile_context>

<pallas_src>
import jax
import jax.numpy as jnp
import numpy as np
from jax.experimental import pallas as pl
from jax.experimental.pallas import tpu as pltpu

# Hyper-parameters (match MultiHeadAttention(h, dk, dv, d_model), FeedForward(d_model, d_ff))
H, DK, DV, D_MODEL, D_FF = 4, 8, 8, 32, 64
NEG_INF = -1e9
LN_EPS = 1e-5


def _layer_norm(x, gamma, beta):
    mu = jnp.mean(x, axis=-1, keepdims=True)
    var = jnp.mean((x - mu) ** 2, axis=-1, keepdims=True)
    return (x - mu) * jax.lax.rsqrt(var + LN_EPS) * gamma + beta


def encoder_layer_kernel(x_ref, mask_ref, wqkv_ref, wof1_ref, w2_ref, vecs_ref, o_ref):
    xf = x_ref[...]                      # (B*S, D_MODEL) f32 token slab
    m3 = mask_ref[...]                   # (B, 1, S)  1 = valid key, 0 = padding
    vecs = vecs_ref[...]                 # (8, PW) f32 packed biases / LN params
    wof1 = wof1_ref[...]                 # (H*DV, D_MODEL + D_FF) bf16  [Wo | W1]

    B = m3.shape[0]
    S = m3.shape[2]
    BS = xf.shape[0]
    HDK, HDV = H * DK, H * DV

    # Static slices of the packed bias/LN slab.  Each row is consumed exactly
    # once below (so there is no repeated broadcast_in_dim to hoist); the
    # implicit broadcast at its single '+' / '*' use is the minimal form.
    b_qkv = vecs[0:1, 0:3 * HDK]
    b_o   = vecs[1:2, 0:D_MODEL]
    g1    = vecs[2:3, 0:D_MODEL]
    bn1   = vecs[3:4, 0:D_MODEL]
    b_f1  = vecs[4:5, 0:D_FF]
    b_f2  = vecs[5:6, 0:D_MODEL]
    g2    = vecs[6:7, 0:D_MODEL]
    bn2   = vecs[7:8, 0:D_MODEL]

    # --- fused QKV projection on the flattened (B*S, D) slab: bf16 x bf16 -> f32
    qkv = jnp.dot(xf.astype(jnp.bfloat16), wqkv_ref[...],
                  preferred_element_type=jnp.float32) + b_qkv
    scale = 1.0 / float(np.sqrt(DK))
    q = (qkv[:, 0:HDK] * scale).reshape(B, S, HDK)       # 1/sqrt(dk) folded into q once
    k = qkv[:, HDK:2 * HDK].reshape(B, S, HDK)
    v = qkv[:, 2 * HDK:2 * HDK + HDV].reshape(B, S, HDV)

    # --- additive key-padding mask bias, computed once ------------------------
    mask_bias = jnp.broadcast_to(
        jnp.where(m3 > 0, 0.0, NEG_INF), (B, S, S))      # (B, S, S)

    # --- per-head attention (batched over batch axis), head output folded
    #     directly into the output projection: attn += ctx_h @ Wo[h*DV:(h+1)*DV]
    #     (removes the sub-128-lane concat of the previous version).
    # TODO(synk): at larger shapes, collapse this static H=4 loop into one
    # dot_general with (b,h) batch dims once Mosaic lowering of the 4-D
    # transpose is verified at those sizes.
    attn = jnp.zeros((BS, D_MODEL), jnp.float32)
    for hi in range(H):                                   # H is small & static
        qh = q[:, :, hi * DK:(hi + 1) * DK]               # (B, S, DK)
        kh = k[:, :, hi * DK:(hi + 1) * DK]
        vh = v[:, :, hi * DV:(hi + 1) * DV]
        s = jnp.einsum('bqd,bkd->bqk', qh, kh,
                       preferred_element_type=jnp.float32) + mask_bias
        s = s - jnp.max(s, axis=-1, keepdims=True)
        p = jnp.exp(s)
        # exact reciprocal (division) — keeps per-layer error ~1e-6 level so a
        # deep stack does not accumulate the approx-EUP error.
        p = p / jnp.sum(p, axis=-1, keepdims=True)
        ctx = jnp.einsum('bqk,bkd->bqd', p, vh,
                         preferred_element_type=jnp.float32)      # (B, S, DV)
        w_o_h = wof1[hi * DV:(hi + 1) * DV, 0:D_MODEL]            # (DV, D) bf16
        attn = attn + jnp.dot(ctx.reshape(BS, DV).astype(jnp.bfloat16), w_o_h,
                              preferred_element_type=jnp.float32)
    attn = attn + b_o

    # --- Add & LayerNorm 1 (f32) ----------------------------------------------
    y = _layer_norm(xf + attn, g1, bn1)

    # --- feed-forward (bf16 weights) + Add & LayerNorm 2 (f32) -----------------
    w_1 = wof1[:, D_MODEL:D_MODEL + D_FF]                 # (D, D_FF) bf16
    h1 = jnp.maximum(
        jnp.dot(y.astype(jnp.bfloat16), w_1, preferred_element_type=jnp.float32) + b_f1,
        0.0)
    ff = jnp.dot(h1.astype(jnp.bfloat16), w2_ref[...],
                 preferred_element_type=jnp.float32) + b_f2

    # TODO(synk): at larger B*S / D_MODEL, present a lane-dense (B, S*D) output
    # slab (wrapper reshape) to get unmasked vst + dense writeback DMA; at
    # (16, 32) the in-kernel sublane->lane relayout would cost more than the
    # handful of masked stores it saves.
    o_ref[...] = _layer_norm(y + ff, g2, bn2)


def pack_params(params):
    """One-time packing: 16 weight/bias tensors -> 3 bf16 weight slabs + 1 f32 vec slab.

    Call this ONCE at init and pass the result to encoder_layer(); it must not
    sit on the per-call path.
    """
    (wq, bq, wk, bk, wv, bv, wo, bo, g1, bn1, w1, bf1, w2, bf2, g2, bn2) = params
    wqkv = jnp.concatenate([wq, wk, wv], axis=1).astype(jnp.bfloat16)   # (D, 3*H*DK)
    assert wo.shape[0] == w1.shape[0]                                    # H*DV == D_MODEL here
    wof1 = jnp.concatenate([wo, w1], axis=1).astype(jnp.bfloat16)        # (D, D_MODEL + D_FF)
    w2b = w2.astype(jnp.bfloat16)                                        # (D_FF, D_MODEL)
    pw = max(3 * H * DK, D_FF, D_MODEL)

    def row(vec):
        return jnp.pad(vec, ((0, 0), (0, pw - vec.shape[1])))

    vecs = jnp.concatenate(
        [row(jnp.concatenate([bq, bk, bv], axis=1)),
         row(bo), row(g1), row(bn1), row(bf1), row(bf2), row(g2), row(bn2)],
        axis=0).astype(jnp.float32)                                      # (8, pw) f32
    return wqkv, wof1, w2b, vecs


def encoder_layer(x, padding_mask, packed_params):
    """x: (B, S, D_MODEL) f32, padding_mask: (B, S) (1 = valid, 0 = pad).

    packed_params = pack_params(raw_params), computed once at init.
    """
    wqkv, wof1, w2, vecs = packed_params
    B, S, D = x.shape
    BS = B * S
    x2 = x.reshape(BS, D)                                 # free wrapper reshape
    mask3 = padding_mask.reshape(B, 1, S).astype(jnp.float32)

    args = (x2, mask3, wqkv, wof1, w2, vecs)

    # Advisory cost hint so XLA can overlap the custom call with neighbors.
    flops = (2 * BS * D * (3 * H * DK)                    # fused QKV
             + H * (2 * B * S * S * DK + 2 * B * S * S * DV)   # attention
             + 2 * BS * (H * DV) * D                      # output projection
             + 2 * BS * D * D_FF + 2 * BS * D_FF * D)     # FFN
    transcendentals = B * H * S * S + 2 * BS              # exp + rsqrt
    bytes_accessed = int(sum(a.size * a.dtype.itemsize for a in args) + BS * D * 4)

    def full_spec(a):
        return pl.BlockSpec(a.shape, lambda i, _nd=a.ndim: (0,) * _nd)

    out = pl.pallas_call(
        encoder_layer_kernel,
        out_shape=jax.ShapeDtypeStruct((BS, D), jnp.float32),
        grid=(1,),                                        # whole batch in one step
        in_specs=[full_spec(a) for a in args],
        out_specs=pl.BlockSpec((BS, D), lambda i: (0, 0)),
        # size-1 grid: "parallel" is a no-op; split the token axis into >=2
        # parallel steps (8-row multiples) before scaling B*S to use v7x's 2nd TC.
        compiler_params=pltpu.CompilerParams(
            dimension_semantics=("arbitrary",)),
        cost_estimate=pl.CostEstimate(flops=flops,
                                      transcendentals=transcendentals,
                                      bytes_accessed=bytes_accessed),
    )(*args)
    return out.reshape(B, S, D)


def init_params(key):
    ks = jax.random.split(key, 8)

    def w(k, shape, fan_in):
        return (jax.random.normal(k, shape, jnp.float32) / np.sqrt(fan_in)).astype(jnp.float32)

    wq = w(ks[0], (D_MODEL, H * DK), D_MODEL); bq = jnp.zeros((1, H * DK), jnp.float32)
    wk = w(ks[1], (D_MODEL, H * DK), D_MODEL); bk = jnp.zeros((1, H * DK), jnp.float32)
    wv = w(ks[2], (D_MODEL, H * DV), D_MODEL); bv = jnp.zeros((1, H * DV), jnp.float32)
    wo = w(ks[3], (H * DV, D_MODEL), H * DV);  bo = jnp.zeros((1, D_MODEL), jnp.float32)
    g1 = jnp.ones((1, D_MODEL), jnp.float32);  bn1 = jnp.zeros((1, D_MODEL), jnp.float32)
    w1 = w(ks[4], (D_MODEL, D_FF), D_MODEL);   bf1 = jnp.zeros((1, D_FF), jnp.float32)
    w2 = w(ks[5], (D_FF, D_MODEL), D_FF);      bf2 = jnp.zeros((1, D_MODEL), jnp.float32)
    g2 = jnp.ones((1, D_MODEL), jnp.float32);  bn2 = jnp.zeros((1, D_MODEL), jnp.float32)
    return (wq, bq, wk, bk, wv, bv, wo, bo, g1, bn1, w1, bf1, w2, bf2, g2, bn2)


def reference_forward(x, mask, params):
    (wq, bq, wk, bk, wv, bv, wo, bo, g1, bn1, w1, bf1, w2, bf2, g2, bn2) = params
    B, S, D = x.shape
    q = (x @ wq + bq).reshape(B, S, H, DK).transpose(0, 2, 1, 3)
    k = (x @ wk + bk).reshape(B, S, H, DK).transpose(0, 2, 1, 3)
    v = (x @ wv + bv).reshape(B, S, H, DV).transpose(0, 2, 1, 3)
    s = jnp.einsum("bhqd,bhkd->bhqk", q, k) / jnp.sqrt(jnp.float32(DK))
    s = jnp.where(mask[:, None, None, :] > 0, s, NEG_INF)
    p = jax.nn.softmax(s, axis=-1)
    o = jnp.einsum("bhqk,bhkd->bhqd", p, v).transpose(0, 2, 1, 3).reshape(B, S, H * DV)
    attn = o @ wo + bo

    def ln(z, g, b):
        mu = z.mean(-1, keepdims=True)
        var = ((z - mu) ** 2).mean(-1, keepdims=True)
        return (z - mu) / jnp.sqrt(var + LN_EPS) * g + b

    y = ln(x + attn, g1, bn1)
    ff = jnp.maximum(y @ w1 + bf1, 0.0) @ w2 + bf2
    return ln(y + ff, g2, bn2)


if __name__ == "__main__":
    key = jax.random.PRNGKey(0)
    kx, kp = jax.random.split(key)

    B, S = 2, 8
    x = jax.random.normal(kx, (B, S, D_MODEL), jnp.float32)
    # padding mask: 1 = valid token, 0 = padding (second sequence has 5 valid tokens)
    lens = jnp.array([S, 5])
    padding_mask = (jnp.arange(S)[None, :] < lens[:, None]).astype(jnp.float32)

    params = init_params(kp)
    packed = pack_params(params)          # one-time packing, off the per-call path

    fwd = jax.jit(encoder_layer)
    out = jax.block_until_ready(fwd(x, padding_mask, packed))

    ref = reference_forward(x, padding_mask, params)
    # Tolerance accounts for the intentional bf16 quantization of the weight
    # slabs (softmax / LayerNorm / accumulation stay in f32 inside the kernel).
    np.testing.assert_allclose(np.asarray(out), np.asarray(ref), rtol=3e-2, atol=3e-2)

    print("KERNEL_OK")
</pallas_src>

<mosaic_0001>
module attributes {stable_mosaic.version = 11 : i64} {
  func.func @encoder_layer_kernel(%arg0: i32, %arg1: memref<16x32xf32, #tpu.memory_space<vmem>>, %arg2: memref<2x1x8xf32, #tpu.memory_space<vmem>>, %arg3: memref<32x96xbf16, #tpu.memory_space<vmem>>, %arg4: memref<32x96xbf16, #tpu.memory_space<vmem>>, %arg5: memref<64x32xbf16, #tpu.memory_space<vmem>>, %arg6: memref<8x96xf32, #tpu.memory_space<vmem>>, %arg7: memref<16x32xf32, #tpu.memory_space<vmem>>) attributes {dimension_semantics = [#tpu.dimension_semantics<arbitrary>], iteration_bounds = array<i64: 1>, scalar_prefetch = 0 : i64, scratch_operands = 0 : i64, tpu.core_type = #tpu.core_type<tc>, window_params = [{pipeline_mode = #tpu.pipeline_mode<synchronous>, transform_indices = @transform_0, window_bounds = array<i64: 16, 32>}, {pipeline_mode = #tpu.pipeline_mode<synchronous>, transform_indices = @transform_1, window_bounds = array<i64: 2, 1, 8>}, {pipeline_mode = #tpu.pipeline_mode<synchronous>, transform_indices = @transform_2, window_bounds = array<i64: 32, 96>}, {pipeline_mode = #tpu.pipeline_mode<synchronous>, transform_indices = @transform_3, window_bounds = array<i64: 32, 96>}, {pipeline_mode = #tpu.pipeline_mode<synchronous>, transform_indices = @transform_4, window_bounds = array<i64: 64, 32>}, {pipeline_mode = #tpu.pipeline_mode<synchronous>, transform_indices = @transform_5, window_bounds = array<i64: 8, 96>}, {pipeline_mode = #tpu.pipeline_mode<synchronous>, transform_indices = @transform_6, window_bounds = array<i64: 16, 32>}]} {
    %c0 = arith.constant 0 : index
    %c0_0 = arith.constant 0 : index
    %0 = vector.load %arg1[%c0, %c0_0] : memref<16x32xf32, #tpu.memory_space<vmem>>, vector<16x32xf32>
    %c0_1 = arith.constant 0 : index
    %c0_2 = arith.constant 0 : index
    %c0_3 = arith.constant 0 : index
    %1 = vector.load %arg2[%c0_1, %c0_2, %c0_3] : memref<2x1x8xf32, #tpu.memory_space<vmem>>, vector<2x1x8xf32>
    %c0_4 = arith.constant 0 : index
    %c0_5 = arith.constant 0 : index
    %2 = vector.load %arg6[%c0_4, %c0_5] : memref<8x96xf32, #tpu.memory_space<vmem>>, vector<8x96xf32>
    %c0_6 = arith.constant 0 : index
    %c0_7 = arith.constant 0 : index
    %3 = vector.load %arg4[%c0_6, %c0_7] : memref<32x96xbf16, #tpu.memory_space<vmem>>, vector<32x96xbf16>
    %4 = vector.extract_strided_slice %2 {offsets = [0, 0], sizes = [1, 96], strides = [1, 1]} : vector<8x96xf32> to vector<1x96xf32>
    %5 = vector.extract_strided_slice %2 {offsets = [1, 0], sizes = [1, 32], strides = [1, 1]} : vector<8x96xf32> to vector<1x32xf32>
    %6 = vector.extract_strided_slice %2 {offsets = [2, 0], sizes = [1, 32], strides = [1, 1]} : vector<8x96xf32> to vector<1x32xf32>
    %7 = vector.extract_strided_slice %2 {offsets = [3, 0], sizes = [1, 32], strides = [1, 1]} : vector<8x96xf32> to vector<1x32xf32>
    %8 = vector.extract_strided_slice %2 {offsets = [4, 0], sizes = [1, 64], strides = [1, 1]} : vector<8x96xf32> to vector<1x64xf32>
    %9 = vector.extract_strided_slice %2 {offsets = [5, 0], sizes = [1, 32], strides = [1, 1]} : vector<8x96xf32> to vector<1x32xf32>
    %10 = vector.extract_strided_slice %2 {offsets = [6, 0], sizes = [1, 32], strides = [1, 1]} : vector<8x96xf32> to vector<1x32xf32>
    %11 = vector.extract_strided_slice %2 {offsets = [7, 0], sizes = [1, 32], strides = [1, 1]} : vector<8x96xf32> to vector<1x32xf32>
    %12 = arith.truncf %0 : vector<16x32xf32> to vector<16x32xbf16>
    %c0_8 = arith.constant 0 : index
    %c0_9 = arith.constant 0 : index
    %13 = vector.load %arg3[%c0_8, %c0_9] : memref<32x96xbf16, #tpu.memory_space<vmem>>, vector<32x96xbf16>
    %cst = arith.constant dense<0.000000e+00> : vector<16x96xf32>
    %14 = tpu.matmul %12, %13, %cst {dimension_numbers = #tpu.dot_dimension_numbers<[1], [0], [0], [1], [0, 0, 1, 1], [], []>} : vector<16x32xbf16>, vector<32x96xbf16>, vector<16x96xf32> -> vector<16x96xf32>
    %15 = vector.broadcast %4 : vector<1x96xf32> to vector<16x96xf32>
    %16 = arith.addf %14, %15 : vector<16x96xf32>
    %17 = vector.extract_strided_slice %16 {offsets = [0, 0], sizes = [16, 32], strides = [1, 1]} : vector<16x96xf32> to vector<16x32xf32>
    %cst_10 = arith.constant 0.353553385 : f32
    %18 = vector.broadcast %cst_10 : f32 to vector<16x32xf32>
    %19 = arith.mulf %17, %18 : vector<16x32xf32>
    %20 = vector.shape_cast %19 : vector<16x32xf32> to vector<2x8x32xf32>
    %21 = vector.extract_strided_slice %16 {offsets = [0, 32], sizes = [16, 32], strides = [1, 1]} : vector<16x96xf32> to vector<16x32xf32>
    %22 = vector.shape_cast %21 : vector<16x32xf32> to vector<2x8x32xf32>
    %23 = vector.extract_strided_slice %16 {offsets = [0, 64], sizes = [16, 32], strides = [1, 1]} : vector<16x96xf32> to vector<16x32xf32>
    %24 = vector.shape_cast %23 : vector<16x32xf32> to vector<2x8x32xf32>
    %cst_11 = arith.constant 0.000000e+00 : f32
    %25 = vector.broadcast %cst_11 : f32 to vector<2x1x8xf32>
    %26 = arith.cmpf ogt, %1, %25 : vector<2x1x8xf32>
    %cst_12 = arith.constant 0.000000e+00 : f32
    %cst_13 = arith.constant -1.000000e+09 : f32
    %27 = vector.broadcast %cst_12 : f32 to vector<2x1x8xf32>
    %28 = vector.broadcast %cst_13 : f32 to vector<2x1x8xf32>
    %29 = arith.select %26, %27, %28 : vector<2x1x8xi1>, vector<2x1x8xf32>
    %30 = vector.shape_cast %29 : vector<2x1x8xf32> to vector<2x1x8xf32>
    %31 = vector.broadcast %30 : vector<2x1x8xf32> to vector<2x8x8xf32>
    %cst_14 = arith.constant 0.000000e+00 : f32
    %32 = vector.broadcast %cst_14 : f32 to vector<16x32xf32>
    %33 = vector.extract_strided_slice %20 {offsets = [0, 0, 0], sizes = [2, 8, 8], strides = [1, 1, 1]} : vector<2x8x32xf32> to vector<2x8x8xf32>
    %34 = vector.extract_strided_slice %22 {offsets = [0, 0, 0], sizes = [2, 8, 8], strides = [1, 1, 1]} : vector<2x8x32xf32> to vector<2x8x8xf32>
    %35 = vector.extract_strided_slice %24 {offsets = [0, 0, 0], sizes = [2, 8, 8], strides = [1, 1, 1]} : vector<2x8x32xf32> to vector<2x8x8xf32>
    "tpu.trace_start"() <{level = 10 : i32, message = "bqd,bkd->bqk"}> : () -> ()
    %cst_15 = arith.constant dense<0.000000e+00> : vector<2x8x8xf32>
    %36 = tpu.matmul %33, %34, %cst_15 {dimension_numbers = #tpu.dot_dimension_numbers<[2], [2], [1], [1], [0, 0, 0, 1, 1, 1], [0], [0]>} : vector<2x8x8xf32>, vector<2x8x8xf32>, vector<2x8x8xf32> -> vector<2x8x8xf32>
    "tpu.trace_stop"() : () -> ()
    %37 = arith.addf %36, %31 : vector<2x8x8xf32>
    %cst_16 = arith.constant dense<0xFF800000> : vector<2x8xf32>
    %38 = vector.multi_reduction <maximumf>, %37, %cst_16 [2] : vector<2x8x8xf32> to vector<2x8xf32>
    %39 = vector.shape_cast %38 : vector<2x8xf32> to vector<2x8x1xf32>
    %40 = vector.broadcast %39 : vector<2x8x1xf32> to vector<2x8x8xf32>
    %41 = arith.subf %37, %40 : vector<2x8x8xf32>
    %42 = math.exp %41 : vector<2x8x8xf32>
    %cst_17 = arith.constant dense<0.000000e+00> : vector<2x8xf32>
    %43 = vector.multi_reduction <add>, %42, %cst_17 [2] : vector<2x8x8xf32> to vector<2x8xf32>
    %44 = vector.shape_cast %43 : vector<2x8xf32> to vector<2x8x1xf32>
    %45 = vector.broadcast %44 : vector<2x8x1xf32> to vector<2x8x8xf32>
    %46 = arith.divf %42, %45 : vector<2x8x8xf32>
    "tpu.trace_start"() <{level = 10 : i32, message = "bqk,bkd->bqd"}> : () -> ()
    %cst_18 = arith.constant dense<0.000000e+00> : vector<2x8x8xf32>
    %47 = tpu.matmul %46, %35, %cst_18 {dimension_numbers = #tpu.dot_dimension_numbers<[2], [1], [1], [2], [0, 0, 0, 1, 1, 2], [0], [0]>} : vector<2x8x8xf32>, vector<2x8x8xf32>, vector<2x8x8xf32> -> vector<2x8x8xf32>
    "tpu.trace_stop"() : () -> ()
    %48 = vector.extract_strided_slice %3 {offsets = [0, 0], sizes = [8, 32], strides = [1, 1]} : vector<32x96xbf16> to vector<8x32xbf16>
    %49 = vector.shape_cast %47 : vector<2x8x8xf32> to vector<16x8xf32>
    %50 = arith.truncf %49 : vector<16x8xf32> to vector<16x8xbf16>
    %cst_19 = arith.constant dense<0.000000e+00> : vector<16x32xf32>
    %51 = tpu.matmul %50, %48, %cst_19 {dimension_numbers = #tpu.dot_dimension_numbers<[1], [0], [0], [1], [0, 0, 1, 1], [], []>} : vector<16x8xbf16>, vector<8x32xbf16>, vector<16x32xf32> -> vector<16x32xf32>
    %52 = arith.addf %32, %51 : vector<16x32xf32>
    %53 = vector.extract_strided_slice %20 {offsets = [0, 0, 8], sizes = [2, 8, 8], strides = [1, 1, 1]} : vector<2x8x32xf32> to vector<2x8x8xf32>
    %54 = vector.extract_strided_slice %22 {offsets = [0, 0, 8], sizes = [2, 8, 8], strides = [1, 1, 1]} : vector<2x8x32xf32> to vector<2x8x8xf32>
    %55 = vector.extract_strided_slice %24 {offsets = [0, 0, 8], sizes = [2, 8, 8], strides = [1, 1, 1]} : vector<2x8x32xf32> to vector<2x8x8xf32>
    "tpu.trace_start"() <{level = 10 : i32, message = "bqd,bkd->bqk"}> : () -> ()
    %cst_20 = arith.constant dense<0.000000e+00> : vector<2x8x8xf32>
    %56 = tpu.matmul %53, %54, %cst_20 {dimension_numbers = #tpu.dot_dimension_numbers<[2], [2], [1], [1], [0, 0, 0, 1, 1, 1], [0], [0]>} : vector<2x8x8xf32>, vector<2x8x8xf32>, vector<2x8x8xf32> -> vector<2x8x8xf32>
    "tpu.trace_stop"() : () -> ()
    %57 = arith.addf %56, %31 : vector<2x8x8xf32>
    %cst_21 = arith.constant dense<0xFF800000> : vector<2x8xf32>
    %58 = vector.multi_reduction <maximumf>, %57, %cst_21 [2] : vector<2x8x8xf32> to vector<2x8xf32>
    %59 = vector.shape_cast %58 : vector<2x8xf32> to vector<2x8x1xf32>
    %60 = vector.broadcast %59 : vector<2x8x1xf32> to vector<2x8x8xf32>
    %61 = arith.subf %57, %60 : vector<2x8x8xf32>
    %62 = math.exp %61 : vector<2x8x8xf32>
    %cst_22 = arith.constant dense<0.000000e+00> : vector<2x8xf32>
    %63 = vector.multi_reduction <add>, %62, %cst_22 [2] : vector<2x8x8xf32> to vector<2x8xf32>
    %64 = vector.shape_cast %63 : vector<2x8xf32> to vector<2x8x1xf32>
    %65 = vector.broadcast %64 : vector<2x8x1xf32> to vector<2x8x8xf32>
    %66 = arith.divf %62, %65 : vector<2x8x8xf32>
    "tpu.trace_start"() <{level = 10 : i32, message = "bqk,bkd->bqd"}> : () -> ()
    %cst_23 = arith.constant dense<0.000000e+00> : vector<2x8x8xf32>
    %67 = tpu.matmul %66, %55, %cst_23 {dimension_numbers = #tpu.dot_dimension_numbers<[2], [1], [1], [2], [0, 0, 0, 1, 1, 2], [0], [0]>} : vector<2x8x8xf32>, vector<2x8x8xf32>, vector<2x8x8xf32> -> vector<2x8x8xf32>
    "tpu.trace_stop"() : () -> ()
    %68 = vector.extract_strided_slice %3 {offsets = [8, 0], sizes = [8, 32], strides = [1, 1]} : vector<32x96xbf16> to vector<8x32xbf16>
    %69 = vector.shape_cast %67 : vector<2x8x8xf32> to vector<16x8xf32>
    %70 = arith.truncf %69 : vector<16x8xf32> to vector<16x8xbf16>
    %cst_24 = arith.constant dense<0.000000e+00> : vector<16x32xf32>
    %71 = tpu.matmul %70, %68, %cst_24 {dimension_numbers = #tpu.dot_dimension_numbers<[1], [0], [0], [1], [0, 0, 1, 1], [], []>} : vector<16x8xbf16>, vector<8x32xbf16>, vector<16x32xf32> -> vector<16x32xf32>
    %72 = arith.addf %52, %71 : vector<16x32xf32>
    %73 = vector.extract_strided_slice %20 {offsets = [0, 0, 16], sizes = [2, 8, 8], strides = [1, 1, 1]} : vector<2x8x32xf32> to vector<2x8x8xf32>
    %74 = vector.extract_strided_slice %22 {offsets = [0, 0, 16], sizes = [2, 8, 8], strides = [1, 1, 1]} : vector<2x8x32xf32> to vector<2x8x8xf32>
    %75 = vector.extract_strided_slice %24 {offsets = [0, 0, 16], sizes = [2, 8, 8], strides = [1, 1, 1]} : vector<2x8x32xf32> to vector<2x8x8xf32>
    "tpu.trace_start"() <{level = 10 : i32, message = "bqd,bkd->bqk"}> : () -> ()
    %cst_25 = arith.constant dense<0.000000e+00> : vector<2x8x8xf32>
    %76 = tpu.matmul %73, %74, %cst_25 {dimension_numbers = #tpu.dot_dimension_numbers<[2], [2], [1], [1], [0, 0, 0, 1, 1, 1], [0], [0]>} : vector<2x8x8xf32>, vector<2x8x8xf32>, vector<2x8x8xf32> -> vector<2x8x8xf32>
    "tpu.trace_stop"() : () -> ()
    %77 = arith.addf %76, %31 : vector<2x8x8xf32>
    %cst_26 = arith.constant dense<0xFF800000> : vector<2x8xf32>
    %78 = vector.multi_reduction <maximumf>, %77, %cst_26 [2] : vector<2x8x8xf32> to vector<2x8xf32>
    %79 = vector.shape_cast %78 : vector<2x8xf32> to vector<2x8x1xf32>
    %80 = vector.broadcast %79 : vector<2x8x1xf32> to vector<2x8x8xf32>
    %81 = arith.subf %77, %80 : vector<2x8x8xf32>
    %82 = math.exp %81 : vector<2x8x8xf32>
    %cst_27 = arith.constant dense<0.000000e+00> : vector<2x8xf32>
    %83 = vector.multi_reduction <add>, %82, %cst_27 [2] : vector<2x8x8xf32> to vector<2x8xf32>
    %84 = vector.shape_cast %83 : vector<2x8xf32> to vector<2x8x1xf32>
    %85 = vector.broadcast %84 : vector<2x8x1xf32> to vector<2x8x8xf32>
    %86 = arith.divf %82, %85 : vector<2x8x8xf32>
    "tpu.trace_start"() <{level = 10 : i32, message = "bqk,bkd->bqd"}> : () -> ()
    %cst_28 = arith.constant dense<0.000000e+00> : vector<2x8x8xf32>
    %87 = tpu.matmul %86, %75, %cst_28 {dimension_numbers = #tpu.dot_dimension_numbers<[2], [1], [1], [2], [0, 0, 0, 1, 1, 2], [0], [0]>} : vector<2x8x8xf32>, vector<2x8x8xf32>, vector<2x8x8xf32> -> vector<2x8x8xf32>
    "tpu.trace_stop"() : () -> ()
    %88 = vector.extract_strided_slice %3 {offsets = [16, 0], sizes = [8, 32], strides = [1, 1]} : vector<32x96xbf16> to vector<8x32xbf16>
    %89 = vector.shape_cast %87 : vector<2x8x8xf32> to vector<16x8xf32>
    %90 = arith.truncf %89 : vector<16x8xf32> to vector<16x8xbf16>
    %cst_29 = arith.constant dense<0.000000e+00> : vector<16x32xf32>
    %91 = tpu.matmul %90, %88, %cst_29 {dimension_numbers = #tpu.dot_dimension_numbers<[1], [0], [0], [1], [0, 0, 1, 1], [], []>} : vector<16x8xbf16>, vector<8x32xbf16>, vector<16x32xf32> -> vector<16x32xf32>
    %92 = arith.addf %72, %91 : vector<16x32xf32>
    %93 = vector.extract_strided_slice %20 {offsets = [0, 0, 24], sizes = [2, 8, 8], strides = [1, 1, 1]} : vector<2x8x32xf32> to vector<2x8x8xf32>
    %94 = vector.extract_strided_slice %22 {offsets = [0, 0, 24], sizes = [2, 8, 8], strides = [1, 1, 1]} : vector<2x8x32xf32> to vector<2x8x8xf32>
    %95 = vector.extract_strided_slice %24 {offsets = [0, 0, 24], sizes = [2, 8, 8], strides = [1, 1, 1]} : vector<2x8x32xf32> to vector<2x8x8xf32>
    "tpu.trace_start"() <{level = 10 : i32, message = "bqd,bkd->bqk"}> : () -> ()
    %cst_30 = arith.constant dense<0.000000e+00> : vector<2x8x8xf32>
    %96 = tpu.matmul %93, %94, %cst_30 {dimension_numbers = #tpu.dot_dimension_numbers<[2], [2], [1], [1], [0, 0, 0, 1, 1, 1], [0], [0]>} : vector<2x8x8xf32>, vector<2x8x8xf32>, vector<2x8x8xf32> -> vector<2x8x8xf32>
    "tpu.trace_stop"() : () -> ()
    %97 = arith.addf %96, %31 : vector<2x8x8xf32>
    %cst_31 = arith.constant dense<0xFF800000> : vector<2x8xf32>
    %98 = vector.multi_reduction <maximumf>, %97, %cst_31 [2] : vector<2x8x8xf32> to vector<2x8xf32>
    %99 = vector.shape_cast %98 : vector<2x8xf32> to vector<2x8x1xf32>
    %100 = vector.broadcast %99 : vector<2x8x1xf32> to vector<2x8x8xf32>
    %101 = arith.subf %97, %100 : vector<2x8x8xf32>
    %102 = math.exp %101 : vector<2x8x8xf32>
    %cst_32 = arith.constant dense<0.000000e+00> : vector<2x8xf32>
    %103 = vector.multi_reduction <add>, %102, %cst_32 [2] : vector<2x8x8xf32> to vector<2x8xf32>
    %104 = vector.shape_cast %103 : vector<2x8xf32> to vector<2x8x1xf32>
    %105 = vector.broadcast %104 : vector<2x8x1xf32> to vector<2x8x8xf32>
    %106 = arith.divf %102, %105 : vector<2x8x8xf32>
    "tpu.trace_start"() <{level = 10 : i32, message = "bqk,bkd->bqd"}> : () -> ()
    %cst_33 = arith.constant dense<0.000000e+00> : vector<2x8x8xf32>
    %107 = tpu.matmul %106, %95, %cst_33 {dimension_numbers = #tpu.dot_dimension_numbers<[2], [1], [1], [2], [0, 0, 0, 1, 1, 2], [0], [0]>} : vector<2x8x8xf32>, vector<2x8x8xf32>, vector<2x8x8xf32> -> vector<2x8x8xf32>
    "tpu.trace_stop"() : () -> ()
    %108 = vector.extract_strided_slice %3 {offsets = [24, 0], sizes = [8, 32], strides = [1, 1]} : vector<32x96xbf16> to vector<8x32xbf16>
    %109 = vector.shape_cast %107 : vector<2x8x8xf32> to vector<16x8xf32>
    %110 = arith.truncf %109 : vector<16x8xf32> to vector<16x8xbf16>
    %cst_34 = arith.constant dense<0.000000e+00> : vector<16x32xf32>
    %111 = tpu.matmul %110, %108, %cst_34 {dimension_numbers = #tpu.dot_dimension_numbers<[1], [0], [0], [1], [0, 0, 1, 1], [], []>} : vector<16x8xbf16>, vector<8x32xbf16>, vector<16x32xf32> -> vector<16x32xf32>
    %112 = arith.addf %92, %111 : vector<16x32xf32>
    %113 = vector.broadcast %5 : vector<1x32xf32> to vector<16x32xf32>
    %114 = arith.addf %112, %113 : vector<16x32xf32>
    %115 = arith.addf %0, %114 : vector<16x32xf32>
    %cst_35 = arith.constant dense<0.000000e+00> : vector<16xf32>
    %116 = vector.multi_reduction <add>, %115, %cst_35 [1] : vector<16x32xf32> to vector<16xf32>
    %117 = vector.shape_cast %116 : vector<16xf32> to vector<16x1xf32>
    %cst_36 = arith.constant 3.200000e+01 : f32
    %118 = vector.broadcast %cst_36 : f32 to vector<16x1xf32>
    %119 = arith.divf %117, %118 : vector<16x1xf32>
    %120 = vector.broadcast %119 : vector<16x1xf32> to vector<16x32xf32>
    %121 = arith.subf %115, %120 : vector<16x32xf32>
    %122 = arith.mulf %121, %121 : vector<16x32xf32>
    %cst_37 = arith.constant dense<0.000000e+00> : vector<16xf32>
    %123 = vector.multi_reduction <add>, %122, %cst_37 [1] : vector<16x32xf32> to vector<16xf32>
    %124 = vector.shape_cast %123 : vector<16xf32> to vector<16x1xf32>
    %cst_38 = arith.constant 3.200000e+01 : f32
    %125 = vector.broadcast %cst_38 : f32 to vector<16x1xf32>
    %126 = arith.divf %124, %125 : vector<16x1xf32>
    %127 = vector.broadcast %119 : vector<16x1xf32> to vector<16x32xf32>
    %128 = arith.subf %115, %127 : vector<16x32xf32>
    %cst_39 = arith.constant 9.99999974E-6 : f32
    %129 = vector.broadcast %cst_39 : f32 to vector<16x1xf32>
    %130 = arith.addf %126, %129 : vector<16x1xf32>
    %131 = math.rsqrt %130 : vector<16x1xf32>
    %132 = vector.broadcast %131 : vector<16x1xf32> to vector<16x32xf32>
    %133 = arith.mulf %128, %132 : vector<16x32xf32>
    %134 = vector.broadcast %6 : vector<1x32xf32> to vector<16x32xf32>
    %135 = arith.mulf %133, %134 : vector<16x32xf32>
    %136 = vector.broadcast %7 : vector<1x32xf32> to vector<16x32xf32>
    %137 = arith.addf %135, %136 : vector<16x32xf32>
    %138 = vector.extract_strided_slice %3 {offsets = [0, 32], sizes = [32, 64], strides = [1, 1]} : vector<32x96xbf16> to vector<32x64xbf16>
    %139 = arith.truncf %137 : vector<16x32xf32> to vector<16x32xbf16>
    %cst_40 = arith.constant dense<0.000000e+00> : vector<16x64xf32>
    %140 = tpu.matmul %139, %138, %cst_40 {dimension_numbers = #tpu.dot_dimension_numbers<[1], [0], [0], [1], [0, 0, 1, 1], [], []>} : vector<16x32xbf16>, vector<32x64xbf16>, vector<16x64xf32> -> vector<16x64xf32>
    %141 = vector.broadcast %8 : vector<1x64xf32> to vector<16x64xf32>
    %142 = arith.addf %140, %141 : vector<16x64xf32>
    %cst_41 = arith.constant 0.000000e+00 : f32
    %143 = vector.broadcast %cst_41 : f32 to vector<16x64xf32>
    %144 = arith.maximumf %142, %143 : vector<16x64xf32>
    %145 = arith.truncf %144 : vector<16x64xf32> to vector<16x64xbf16>
    %c0_42 = arith.constant 0 : index
    %c0_43 = arith.constant 0 : index
    %146 = vector.load %arg5[%c0_42, %c0_43] : memref<64x32xbf16, #tpu.memory_space<vmem>>, vector<64x32xbf16>
    %cst_44 = arith.constant dense<0.000000e+00> : vector<16x32xf32>
    %147 = tpu.matmul %145, %146, %cst_44 {dimension_numbers = #tpu.dot_dimension_numbers<[1], [0], [0], [1], [0, 0, 1, 1], [], []>} : vector<16x64xbf16>, vector<64x32xbf16>, vector<16x32xf32> -> vector<16x32xf32>
    %148 = vector.broadcast %9 : vector<1x32xf32> to vector<16x32xf32>
    %149 = arith.addf %147, %148 : vector<16x32xf32>
    %150 = arith.addf %137, %149 : vector<16x32xf32>
    %cst_45 = arith.constant dense<0.000000e+00> : vector<16xf32>
    %151 = vector.multi_reduction <add>, %150, %cst_45 [1] : vector<16x32xf32> to vector<16xf32>
    %152 = vector.shape_cast %151 : vector<16xf32> to vector<16x1xf32>
    %cst_46 = arith.constant 3.200000e+01 : f32
    %153 = vector.broadcast %cst_46 : f32 to vector<16x1xf32>
    %154 = arith.divf %152, %153 : vector<16x1xf32>
    %155 = vector.broadcast %154 : vector<16x1xf32> to vector<16x32xf32>
    %156 = arith.subf %150, %155 : vector<16x32xf32>
    %157 = arith.mulf %156, %156 : vector<16x32xf32>
    %cst_47 = arith.constant dense<0.000000e+00> : vector<16xf32>
    %158 = vector.multi_reduction <add>, %157, %cst_47 [1] : vector<16x32xf32> to vector<16xf32>
    %159 = vector.shape_cast %158 : vector<16xf32> to vector<16x1xf32>
    %cst_48 = arith.constant 3.200000e+01 : f32
    %160 = vector.broadcast %cst_48 : f32 to vector<16x1xf32>
    %161 = arith.divf %159, %160 : vector<16x1xf32>
    %162 = vector.broadcast %154 : vector<16x1xf32> to vector<16x32xf32>
    %163 = arith.subf %150, %162 : vector<16x32xf32>
    %cst_49 = arith.constant 9.99999974E-6 : f32
    %164 = vector.broadcast %cst_49 : f32 to vector<16x1xf32>
    %165 = arith.addf %161, %164 : vector<16x1xf32>
    %166 = math.rsqrt %165 : vector<16x1xf32>
    %167 = vector.broadcast %166 : vector<16x1xf32> to vector<16x32xf32>
    %168 = arith.mulf %163, %167 : vector<16x32xf32>
    %169 = vector.broadcast %10 : vector<1x32xf32> to vector<16x32xf32>
    %170 = arith.mulf %168, %169 : vector<16x32xf32>
    %171 = vector.broadcast %11 : vector<1x32xf32> to vector<16x32xf32>
    %172 = arith.addf %170, %171 : vector<16x32xf32>
    %c0_50 = arith.constant 0 : index
    %c0_51 = arith.constant 0 : index
    %173 = vector.load %arg7[%c0_50, %c0_51] : memref<16x32xf32, #tpu.memory_space<vmem>>, vector<16x32xf32>
    tpu.vector_store %arg7[%c0_50, %c0_51], %172 {strides = array<i32>} : memref<16x32xf32, #tpu.memory_space<vmem>>, vector<16x32xf32>,
    return
  }
  func.func @transform_0(%arg0: i32) -> (i32, i32) {
    %c0_i32 = arith.constant 0 : i32
    %c0_i32_0 = arith.constant 0 : i32
    %c0_i32_1 = arith.constant 0 : i32
    return %c0_i32, %c0_i32_0 : i32, i32
  }
  func.func @transform_1(%arg0: i32) -> (i32, i32, i32) {
    %c0_i32 = arith.constant 0 : i32
    %c0_i32_0 = arith.constant 0 : i32
    %c0_i32_1 = arith.constant 0 : i32
    %c0_i32_2 = arith.constant 0 : i32
    return %c0_i32, %c0_i32_0, %c0_i32_1 : i32, i32, i32
  }
  func.func @transform_2(%arg0: i32) -> (i32, i32) {
    %c0_i32 = arith.constant 0 : i32
    %c0_i32_0 = arith.constant 0 : i32
    %c0_i32_1 = arith.constant 0 : i32
    return %c0_i32, %c0_i32_0 : i32, i32
  }
  func.func @transform_3(%arg0: i32) -> (i32, i32) {
    %c0_i32 = arith.constant 0 : i32
    %c0_i32_0 = arith.constant 0 : i32
    %c0_i32_1 = arith.constant 0 : i32
    return %c0_i32, %c0_i32_0 : i32, i32
  }
  func.func @transform_4(%arg0: i32) -> (i32, i32) {
    %c0_i32 = arith.constant 0 : i32
    %c0_i32_0 = arith.constant 0 : i32
    %c0_i32_1 = arith.constant 0 : i32
    return %c0_i32, %c0_i32_0 : i32, i32
  }
  func.func @transform_5(%arg0: i32) -> (i32, i32) {
    %c0_i32 = arith.constant 0 : i32
    %c0_i32_0 = arith.constant 0 : i32
    %c0_i32_1 = arith.constant 0 : i32
    return %c0_i32, %c0_i32_0 : i32, i32
  }
  func.func @transform_6(%arg0: i32) -> (i32, i32) {
    %c0_i32 = arith.constant 0 : i32
    %c0_i32_0 = arith.constant 0 : i32
    %c0_i32_1 = arith.constant 0 : i32
    return %c0_i32, %c0_i32_0 : i32, i32
  }
}

</mosaic_0001>

<bundles_post_ra>
// kernel: encoder_layer.1
= control target key start
LH: loop header
LB: loop body
LE: loop exit
PB: predicated region body
PF: predicated region fallthrough
CT: control target
= control target key end

     0   :  { %v2201_v1 = vmov 0.0   ;;  %vm2202_vm0 = vmmov 0   ;;  %vm55_vm1 = vcmask 261120   ;;  %s2555_s0 = inlined_call_operand.vmem [shape: f32[16,32], index: 0, kind: input, shape index: {}]   ;;  %s2556_s1 = inlined_call_operand.vmem [shape: f32[2,1,8], index: 1, kind: input, shape index: {}]   ;;  %s2557_s2 = inlined_call_operand.vmem [shape: bf16[32,96], index: 2, kind: input, shape index: {}]   ;;  %s2558_s3 = inlined_call_operand.vmem [shape: bf16[32,96], index: 3, kind: input, shape index: {}]   ;;  %s2559_s4 = inlined_call_operand.vmem [shape: bf16[64,32], index: 4, kind: input, shape index: {}]   ;;  %s2560_s5 = inlined_call_operand.vmem [shape: f32[8,96], index: 5, kind: input, shape index: {}]   ;;  %s2561_s6 = inlined_call_operand.hbm [shape: f32[16,32], index: 6, kind: output, shape index: {}]  }
   0x1   :  { %v2129_v0 = vld [vmem:[%s2557_s2] sm:$0xff]   ;;  %1980 = vmatprep.subr.bf16.mxu0 %v2201_v1  ;;  %1993 = vmatprep.subr.mxu1 %v2201_v1  ;;  %v2130_v2 = vld [vmem:[%s2557_s2 + $0x8] sm:$0xff]  }
   0x2   :  { %1981 = vmatpush3.bf16.msra.mxu0 %v2129_v0  ;;  %1984 = vmatprep.mubr.msk.bf16.mxu0 %vm2202_vm0, %v2201_v1  ;;  %v2266_v3 = vld [vmem:[%s2555_s0] sm:$0xff]  ;;  %v2271_v4 = vld [vmem:[%s2555_s0 + $0x8] sm:$0xff] }
   0x3   :  { %1982 = vmatprep.subr.bf16.mxu0 %v2201_v1  ;;  %1995 = vmatprep.mubr.msk.f32.mxu1 %vm2202_vm0, %v2201_v1  ;;  %v34_v5 = vpack.c.bf16 %v2271_v4, %v2266_v3 }
   0x6   :  { %1983 = vmatpush3.bf16.msra.mxu0 %v2130_v2 }
   0x7   :  { %11 = vsyncpa [#allocation3], 0  ;;  %1988 = vmatprep.subr.mxu0 %v2201_v1  ;;  %v39_v6 = vlaneseq  ;;  %v2288_v9 = vld [vmem:[%s2560_s5] sm:$0xff]  ;;  %s2203_s29 = smov 96   ;;  %vm121_vm2 = vcmask 64512   ;;  %s2206_s9 = smov 88  }
   0x8   :  { %v27_v21 = vld [vmem:[%s2556_s1] sm:$0x1]  ;;  %v28_v22 = vld [vmem:[%s2556_s1 + $0x1] sm:$0x1]  ;;  %v2204_v23 = vmov -1e+09  }
   0x9   :  { %1985 = vmatmul.mubr.msk.bf16.vlgmr.msra.gmra.mrb[0].mxu0 %vm55_vm1, %v34_v5  ;;  %v2282_v7 = vshrl.u32 %v39_v6, 7  ;;  %vm102_vm3 = vcmp.gt.f32.partialorder %v27_v21, 0.0  ;;  %vm103_vm4 = vcmp.gt.f32.partialorder %v28_v22, 0.0  ;;  %s2205_s1 = smov 64   ;;  %s2207_s10 = smov 120   ;;  %vm784_vm5 = vcmask 1043456  }
   0xa   :  { %1990 = vmatprep.mubr.msk.f32.mxu0 %vm2202_vm0, %v2201_v1  ;;  %v104_v24 = vsel %vm102_vm3, 0.0, %v2204_v23  ;;  %v105_v26 = vsel %vm103_vm4, 0.0, %v2204_v23  ;;  %s2208_s11 = smov 56   ;;  %s2209_s12 = smov 80   ;;  %vm1787_vm6 = vcmask 523264  }
   0xb   :  { %v41_v8 = vsub.s32 0, %v2282_v7  ;;  %s2210_s13 = smov 112   ;;  %s2211_s14 = smov 72  }
   0xc   :  { %s2212_s19 = smov 48   ;;  %s2213_s20 = smov 104  }
   0xd   :  { %v42_v10 = vrot.slane %v2288_v9, %v41_v8  ;;  %v2323_v25 = vrot.slane %v104_v24, %v41_v8  ;;  %v2326_v30 = vrot.slane %v105_v26, %v41_v8  ;;  %s2214_s21 = smov 40  }
  0xdc   :  { %v93_v11 = vpop.f32.mrb[0].mxu0 }
  0xdd   :  { %v2291_v12 = vadd.f32 %v93_v11, %v42_v10  ;;  %v1986_v13 = vpop.f32.mrb[1].mxu0 }
  0xde   :  { %v96_v14 = vpop.f32.mrb[2].mxu0 }
  0xdf   :  { %119 = vrot.lane.b32.xlu0 %v2291_v12, %s2203_s29  ;;  %v1987_v15 = vpop.f32.mrb[3].mxu0  ;;  %v2295_v16 = vadd.f32 %v96_v14, %v42_v10  ;;  %v2301_v18 = vmul.f32 0.35355338, %v2291_v12 }
  0xe1   :  { %v2310_v20 = vmul.f32 0.35355338, %v2295_v16 }
  0xe3   :  { %198 = vrot.lane.b32.xlu0 %v2295_v16, %s2203_s29 }
 0x151   :  { %v120_v17 = vpop.permute.xlu0 %119 }
 0x152   :  { %1989 = vmatpush3.xpose.msk.msra.mxu0 %vm121_vm2, %v120_v17 }
 0x153   :  { %2003 = vmatprep.subr.mxu0 %v2201_v1 }
 0x155   :  { %1991 = vmatmul.mubr.msk.f32.vlgmr.msra.gmra.mrb[4].mxu0 %vm121_vm2, %v2301_v18  ;;  %v199_v19 = vpop.permute.xlu0 %198 }
 0x156   :  { %1994 = vmatpush3.xpose.msk.msra.mxu1 %vm121_vm2, %v199_v19  ;;  %2005 = vmatprep.mubr.msk.f32.mxu0 %vm2202_vm0, %v2201_v1 }
 0x157   :  { %1998 = vmatprep.subr.mxu1 %v2201_v1 }
 0x159   :  { %1996 = vmatmul.mubr.msk.f32.vlgmr.msra.gmra.mrb[0].mxu1 %vm121_vm2, %v2310_v20 }
 0x15a   :  { %2000 = vmatprep.mubr.msk.f32.mxu1 %vm2202_vm0, %v2201_v1 }
 0x228   :  { %v193_v27 = vpop.f32.mrb[4].mxu0 }
 0x229   :  { %v194_v28 = vadd.f32 %v193_v27, %v2323_v25  ;;  %v1992_v29 = vpop.f32.mrb[5].mxu0 }
 0x22b   :  { %v275_v31 = vsel %vm121_vm2, %v194_v28, -inf }
 0x22c   :  { %v271_v32 = vpop.f32.mrb[0].mxu1  ;;  %276 = vmax.xlane.f32.xlu1 %v275_v31 }
 0x22d   :  { %v272_v33 = vadd.f32 %v271_v32, %v2326_v30  ;;  %v1997_v34 = vpop.f32.mrb[1].mxu1  ;;  %v2381_v32 = vld [vmem:[%s2558_s3 + $0x4] sm:$0xf] }
 0x22f   :  { %v278_v35 = vsel %vm121_vm2, %v272_v33, -inf }
 0x230   :  { %279 = vmax.xlane.f32.xlu1 %v278_v35  ;;  %v786_v35 = vsel %vm784_vm5, %v2381_v32, 0 }
 0x241   :  { %297 = vrot.lane.b32.xlu1 %v2291_v12, %s2205_s1 }
 0x245   :  { %373 = vrot.lane.b32.xlu1 %v2295_v16, %s2205_s1 }
 0x249   :  { %452 = vrot.lane.b32.xlu1 %v2291_v12, %s2206_s9 }
 0x24d   :  { %530 = vrot.lane.b32.xlu1 %v2295_v16, %s2206_s9 }
 0x2b9   :  { %v277_v36 = vpop.xlane.xlu1 %276 }
 0x2ba   :  { %v281_v37 = vsub.f32 %v194_v28, %v277_v36  ;;  %v2389_v36 = vld [vmem:[%s2558_s3] sm:$0xf] }
 0x2bc   :  { %v283_v38 = vmul.f32 1.442695, %v281_v37 }
 0x2bd   :  { %v280_v39 = vpop.xlane.xlu1 %279 }
 0x2be   :  { %2137 = vpow2.f32 %v283_v38  ;;  %v282_v40 = vsub.f32 %v272_v33, %v280_v39  ;;  %v833_v39 = vsel %vm784_vm5, %v2389_v36, 0 }
 0x2c0   :  { %v285_v41 = vmul.f32 1.442695, %v282_v40 }
 0x2c1   :  { %v298_v42 = vpop.permute.xlu1 %297 }
 0x2c2   :  { %2139 = vpow2.f32 %v285_v41  ;;  %1999 = vmatpush3.msra.mxu1 %v298_v42 }
 0x2c3   :  { %2008 = vmatprep.subr.mxu1 %v2201_v1 }
 0x2c5   :  { %v374_v43 = vpop.permute.xlu1 %373 }
 0x2c6   :  { %2004 = vmatpush3.msra.mxu0 %v374_v43 }
 0x2c7   :  { %2013 = vmatprep.subr.mxu0 %v2201_v1 }
 0x2c8   :  { %v2138_v44 = vpop.eup %2137 }
 0x2c9   :  { %v287_v45 = vsel %vm121_vm2, %v2138_v44, 0.0  ;;  %v453_v48 = vpop.permute.xlu1 %452 }
 0x2ca   :  { %288 = vadd.xlane.f32.xlu0 %v287_v45 }
 0x2cc   :  { %v2140_v46 = vpop.eup %2139 }
 0x2cd   :  { %v290_v47 = vsel %vm121_vm2, %v2140_v46, 0.0  ;;  %v531_v49 = vpop.permute.xlu1 %530 }
 0x2ce   :  { %291 = vadd.xlane.f32.xlu1 %v290_v47 }
 0x2df   :  { %528 = vrot.lane.b32.xlu1 %v2310_v20, %s2207_s10 }
 0x2e0   :  { %450 = vrot.lane.b32.xlu0 %v2301_v18, %s2207_s10 }
 0x357   :  { %v289_v50 = vpop.xlane.xlu0 %288 }
 0x358   :  { %2141 = vrcp.f32 %v289_v50 }
 0x35b   :  { %v292_v51 = vpop.xlane.xlu1 %291  ;;  %v451_v56 = vpop.permute.xlu0 %450 }
 0x35c   :  { %2143 = vrcp.f32 %v292_v51 }
 0x35f   :  { %v529_v57 = vpop.permute.xlu1 %528 }
 0x362   :  { %v2142_v52 = vpop.eup %2141 }
 0x363   :  { %v294_v53 = vmul.f32 %v2142_v52, %v2138_v44 }
 0x365   :  { %2001 = vmatmul.mubr.msk.f32.vlgmr.msra.gmra.mrb[2].mxu1 %vm121_vm2, %v294_v53 }
 0x366   :  { %v2144_v54 = vpop.eup %2143  ;;  %2009 = vmatpush3.xpose.msk.msra.mxu1 %vm121_vm2, %v453_v48  ;;  %2010 = vmatprep.mubr.msk.f32.mxu1 %vm2202_vm0, %v2201_v1 }
 0x367   :  { %v296_v55 = vmul.f32 %v2144_v54, %v2140_v46  ;;  %2018 = vmatprep.subr.mxu1 %v2201_v1 }
 0x369   :  { %2006 = vmatmul.mubr.msk.f32.vlgmr.msra.gmra.mrb[6].mxu0 %vm121_vm2, %v296_v55  ;;  %2011 = vmatmul.mubr.msk.f32.vlgmr.msra.gmra.mrb[4].mxu1 %vm121_vm2, %v451_v56 }
 0x36a   :  { %2014 = vmatpush3.xpose.msk.msra.mxu0 %vm121_vm2, %v531_v49  ;;  %2015 = vmatprep.mubr.msk.f32.mxu0 %vm2202_vm0, %v2201_v1 }
 0x36b   :  { %2023 = vmatprep.subr.mxu0 %v2201_v1  ;;  %2020 = vmatprep.mubr.msk.f32.mxu1 %vm2202_vm0, %v2201_v1 }
 0x36d   :  { %2016 = vmatmul.mubr.msk.f32.vlgmr.msra.gmra.mrb[8].mxu0 %vm121_vm2, %v529_v57 }
 0x36e   :  { %2025 = vmatprep.mubr.msk.f32.mxu0 %vm2202_vm0, %v2201_v1 }
 0x438   :  { %v2357_v58 = vpop.f32.mrb[2].mxu1 }
 0x439   :  { %v2002_v59 = vpop.f32.mrb[3].mxu1 }
 0x43c   :  { %v2359_v60 = vpop.f32.mrb[6].mxu0  ;;  %v524_v61 = vpop.f32.mrb[4].mxu1 }
 0x43d   :  { %v449_v62 = vpack.c.bf16 %v2359_v60, %v2357_v58  ;;  %v525_v63 = vadd.f32 %v524_v61, %v2323_v25  ;;  %v2007_v0 = vpop.f32.mrb[7].mxu0  ;;  %v2012_v2 = vpop.f32.mrb[5].mxu1 }
 0x43f   :  { %v606_v5 = vsel %vm121_vm2, %v525_v63, -inf }
 0x440   :  { %607 = vmax.xlane.f32.xlu1 %v606_v5  ;;  %v602_v6 = vpop.f32.mrb[8].mxu0 }
 0x441   :  { %v603_v8 = vadd.f32 %v602_v6, %v2326_v30  ;;  %v2017_v10 = vpop.f32.mrb[9].mxu0 }
 0x443   :  { %v609_v11 = vsel %vm121_vm2, %v603_v8, -inf }
 0x444   :  { %610 = vmax.xlane.f32.xlu0 %v609_v11 }
 0x45a   :  { %704 = vrot.lane.b32.xlu0 %v2295_v16, %s2208_s11 }
 0x45e   :  { %878 = vrot.lane.b32.xlu0 %v2291_v12, %s2209_s12 }
 0x4cd   :  { %v608_v13 = vpop.xlane.xlu1 %607 }
 0x4ce   :  { %v612_v14 = vsub.f32 %v525_v63, %v608_v13 }
 0x4d0   :  { %v614_v15 = vmul.f32 1.442695, %v612_v14 }
 0x4d1   :  { %v611_v17 = vpop.xlane.xlu0 %610 }
 0x4d2   :  { %2145 = vpow2.f32 %v614_v15  ;;  %v613_v19 = vsub.f32 %v603_v8, %v611_v17 }
 0x4d4   :  { %v616_v21 = vmul.f32 1.442695, %v613_v19 }
 0x4d5   :  { %v705_v22 = vpop.permute.xlu0 %704 }
 0x4d6   :  { %2147 = vpow2.f32 %v616_v21  ;;  %2024 = vmatpush3.msra.mxu0 %v705_v22 }
 0x4d7   :  { %2034 = vmatprep.subr.bf16.mxu0 %v2201_v1 }
 0x4d9   :  { %v879_v47 = vpop.permute.xlu0 %878 }
 0x4dc   :  { %v2146_v23 = vpop.eup %2145 }
 0x4dd   :  { %v618_v24 = vsel %vm121_vm2, %v2146_v23, 0.0 }
 0x4de   :  { %619 = vadd.xlane.f32.xlu1 %v618_v24 }
 0x4e0   :  { %v2148_v26 = vpop.eup %2147 }
 0x4e1   :  { %v621_v27 = vsel %vm121_vm2, %v2148_v26, 0.0 }
 0x4e2   :  { %622 = vadd.xlane.f32.xlu1 %v621_v27 }
 0x4f3   :  { %628 = vrot.lane.b32.xlu1 %v2291_v12, %s2208_s11 }
 0x4f7   :  { %956 = vrot.lane.b32.xlu1 %v2295_v16, %s2209_s12 }
 0x4fb   :  { %954 = vrot.lane.b32.xlu1 %v2310_v20, %s2210_s13 }
 0x4ff   :  { %876 = vrot.lane.b32.xlu1 %v2301_v18, %s2210_s13 }
 0x503   :  { %1258 = vrot.lane.b32.xlu1 %v2291_v12, %s2211_s14 }
 0x56b   :  { %v620_v28 = vpop.xlane.xlu1 %619 }
 0x56c   :  { %2149 = vrcp.f32 %v620_v28 }
 0x56f   :  { %v623_v29 = vpop.xlane.xlu1 %622 }
 0x570   :  { %2151 = vrcp.f32 %v623_v29 }
 0x573   :  { %v629_v31 = vpop.permute.xlu1 %628 }
 0x574   :  { %2019 = vmatpush3.msra.mxu1 %v629_v31 }
 0x575   :  { %2028 = vmatprep.subr.bf16.mxu1 %v2201_v1 }
 0x576   :  { %v2150_v33 = vpop.eup %2149 }
 0x577   :  { %v625_v34 = vmul.f32 %v2150_v33, %v2146_v23  ;;  %v957_v40 = vpop.permute.xlu1 %956 }
 0x579   :  { %2021 = vmatmul.mubr.msk.f32.vlgmr.msra.gmra.mrb[6].mxu1 %vm121_vm2, %v625_v34 }
 0x57a   :  { %v2152_v37 = vpop.eup %2151  ;;  %2029 = vmatpush3.bf16.msra.mxu1 %v786_v35  ;;  %2030 = vmatprep.mubr.msk.bf16.mxu1 %vm2202_vm0, %v2201_v1 }
 0x57b   :  { %v627_v38 = vmul.f32 %v2152_v37, %v2148_v26  ;;  %2040 = vmatprep.subr.mxu1 %v2201_v1  ;;  %v955_v41 = vpop.permute.xlu1 %954 }
 0x57d   :  { %2026 = vmatmul.mubr.msk.f32.vlgmr.msra.gmra.mrb[10].mxu0 %vm121_vm2, %v627_v38 }
 0x57e   :  { %2035 = vmatpush3.bf16.msra.mxu0 %v833_v39  ;;  %2036 = vmatprep.mubr.msk.bf16.mxu0 %vm2202_vm0, %v2201_v1 }
 0x57f   :  { %2045 = vmatprep.subr.mxu0 %v2201_v1  ;;  %v877_v52 = vpop.permute.xlu1 %876 }
 0x581   :  { %2037 = vmatmul.mubr.msk.bf16.vlgmr.msra.gmra.mrb[12].mxu0 %vm121_vm2, %v449_v62 }
 0x582   :  { %2047 = vmatprep.mubr.msk.f32.mxu0 %vm2202_vm0, %v2201_v1 }
 0x583   :  { %v1259_v13 = vpop.permute.xlu1 %1258 }
 0x587   :  { %2046 = vmatpush3.xpose.msk.msra.mxu0 %vm121_vm2, %v957_v40 }
 0x588   :  { %2055 = vmatprep.subr.mxu0 %v2201_v1 }
 0x58a   :  { %2048 = vmatmul.mubr.msk.f32.vlgmr.msra.gmra.mrb[16].mxu0 %vm121_vm2, %v955_v41 }
 0x58b   :  { %2057 = vmatprep.mubr.msk.f32.mxu0 %vm2202_vm0, %v2201_v1 }
 0x64c   :  { %v700_v42 = vpop.f32.mrb[6].mxu1 }
 0x64d   :  { %v2022_v43 = vpop.f32.mrb[7].mxu1 }
 0x650   :  { %v776_v44 = vpop.f32.mrb[10].mxu0 }
 0x651   :  { %v780_v45 = vpack.c.bf16 %v776_v44, %v700_v42  ;;  %v2027_v46 = vpop.f32.mrb[11].mxu0 }
 0x652   :  { %v2466_v46 = vld [vmem:[%s2558_s3 + $0x8] sm:$0xf] }
 0x653   :  { %2031 = vmatmul.mubr.msk.bf16.vlgmr.msra.gmra.mrb[8].mxu1 %vm121_vm2, %v780_v45 }
 0x654   :  { %2041 = vmatpush3.xpose.msk.msra.mxu1 %vm121_vm2, %v879_v47  ;;  %v869_v48 = vpop.f32.mrb[12].mxu0  ;;  %2042 = vmatprep.mubr.msk.f32.mxu1 %vm2202_vm0, %v2201_v1  ;;  %v1211_v47 = vsel %vm784_vm5, %v2466_v46, 0 }
 0x655   :  { %v2038_v49 = vpop.f32.mrb[13].mxu0  ;;  %2050 = vmatprep.subr.mxu1 %v2201_v1 }
 0x656   :  { %v872_v50 = vpop.f32.mrb[14].mxu0 }
 0x657   :  { %v2039_v51 = vpop.f32.mrb[15].mxu0 }
 0x65b   :  { %2043 = vmatmul.mubr.msk.f32.vlgmr.msra.gmra.mrb[12].mxu1 %vm121_vm2, %v877_v52 }
 0x65c   :  { %2052 = vmatprep.mubr.msk.f32.mxu1 %vm2202_vm0, %v2201_v1 }
 0x65d   :  { %v1028_v53 = vpop.f32.mrb[16].mxu0 }
 0x65e   :  { %v1029_v54 = vadd.f32 %v1028_v53, %v2326_v30  ;;  %v2049_v55 = vpop.f32.mrb[17].mxu0 }
 0x660   :  { %v1035_v56 = vsel %vm121_vm2, %v1029_v54, -inf }
 0x661   :  { %1036 = vmax.xlane.f32.xlu0 %v1035_v56 }
 0x677   :  { %1130 = vrot.lane.b32.xlu0 %v2295_v16, %s2212_s19 }
 0x67b   :  { %1256 = vrot.lane.b32.xlu0 %v2301_v18, %s2213_s20 }
 0x67f   :  { %1334 = vrot.lane.b32.xlu0 %v2310_v20, %s2213_s20 }
 0x6ee   :  { %v1037_v57 = vpop.xlane.xlu0 %1036 }
 0x6ef   :  { %v1039_v58 = vsub.f32 %v1029_v54, %v1037_v57 }
 0x6f1   :  { %v1042_v59 = vmul.f32 1.442695, %v1039_v58 }
 0x6f2   :  { %v1131_v60 = vpop.permute.xlu0 %1130 }
 0x6f3   :  { %2153 = vpow2.f32 %v1042_v59  ;;  %2056 = vmatpush3.msra.mxu0 %v1131_v60 }
 0x6f4   :  { %2066 = vmatprep.subr.mxu0 %v2201_v1 }
 0x6f6   :  { %v1257_v19 = vpop.permute.xlu0 %1256 }
 0x6fa   :  { %v1335_v22 = vpop.permute.xlu0 %1334 }
 0x6fd   :  { %v2154_v61 = vpop.eup %2153 }
 0x6fe   :  { %v1047_v62 = vsel %vm121_vm2, %v2154_v61, 0.0 }
 0x6ff   :  { %1048 = vadd.xlane.f32.xlu1 %v1047_v62 }
 0x710   :  { %1336 = vrot.lane.b32.xlu1 %v2295_v16, %s2211_s14 }
 0x726   :  { %v822_v63 = vpop.f32.mrb[8].mxu1 }
 0x727   :  { %v2430_v0 = vadd.f32 %v869_v48, %v822_v63  ;;  %v2032_v18 = vpop.f32.mrb[9].mxu1 }
 0x728   :  { %v825_v20 = vpop.f32.mrb[10].mxu1 }
 0x729   :  { %v2432_v2 = vadd.f32 %v872_v50, %v825_v20  ;;  %v2033_v5 = vpop.f32.mrb[11].mxu1  ;;  %v33_v20 = vld [vmem:[%s2558_s3 + $0xc] sm:$0xf] }
 0x72a   :  { %v1591_v5 = vsel %vm784_vm5, %v33_v20, 0 }
 0x72e   :  { %v950_v6 = vpop.f32.mrb[12].mxu1 }
 0x72f   :  { %v951_v8 = vadd.f32 %v950_v6, %v2323_v25  ;;  %v2044_v10 = vpop.f32.mrb[13].mxu1 }
 0x731   :  { %v1032_v11 = vsel %vm121_vm2, %v951_v8, -inf }
 0x734   :  { %1033 = vmax.xlane.f32.xlu1 %v1032_v11 }
 0x78c   :  { %v1049_v14 = vpop.xlane.xlu1 %1048 }
 0x78d   :  { %2155 = vrcp.f32 %v1049_v14 }
 0x790   :  { %v1337_v21 = vpop.permute.xlu1 %1336 }
 0x797   :  { %v2156_v15 = vpop.eup %2155 }
 0x798   :  { %v1053_v17 = vmul.f32 %v2156_v15, %v2154_v61 }
 0x79a   :  { %2058 = vmatmul.mubr.msk.f32.vlgmr.msra.gmra.mrb[18].mxu0 %vm121_vm2, %v1053_v17 }
 0x79b   :  { %2067 = vmatpush3.xpose.msk.msra.mxu0 %vm121_vm2, %v1259_v13  ;;  %2068 = vmatprep.mubr.msk.f32.mxu0 %vm2202_vm0, %v2201_v1 }
 0x79c   :  { %2071 = vmatprep.subr.mxu0 %v2201_v1 }
 0x79e   :  { %2069 = vmatmul.mubr.msk.f32.vlgmr.msra.gmra.mrb[20].mxu0 %vm121_vm2, %v1257_v19 }
 0x79f   :  { %2072 = vmatpush3.xpose.msk.msra.mxu0 %vm121_vm2, %v1337_v21  ;;  %2073 = vmatprep.mubr.msk.f32.mxu0 %vm2202_vm0, %v2201_v1 }
 0x7a0   :  { %2081 = vmatprep.subr.mxu0 %v2201_v1 }
 0x7a2   :  { %2074 = vmatmul.mubr.msk.f32.vlgmr.msra.gmra.mrb[22].mxu0 %vm121_vm2, %v1335_v22 }
 0x7a3   :  { %2083 = vmatprep.mubr.msk.f32.mxu0 %vm2202_vm0, %v2201_v1 }
 0x7c1   :  { %v1034_v23 = vpop.xlane.xlu1 %1033 }
 0x7c2   :  { %v1038_v24 = vsub.f32 %v951_v8, %v1034_v23  ;;  %v1638_v23 = vsub.s32 1, %v2282_v7 }
 0x7c4   :  { %v1040_v26 = vmul.f32 1.442695, %v1038_v24  ;;  %v1639_v24 = vrot.slane %v2288_v9, %v1638_v23 }
 0x7c6   :  { %2157 = vpow2.f32 %v1040_v26 }
 0x7d0   :  { %v2158_v27 = vpop.eup %2157 }
 0x7d1   :  { %v1044_v28 = vsel %vm121_vm2, %v2158_v27, 0.0 }
 0x7d2   :  { %1045 = vadd.xlane.f32.xlu0 %v1044_v28 }
 0x7e8   :  { %1054 = vrot.lane.b32.xlu0 %v2291_v12, %s2212_s19 }
 0x7ec   :  { %1510 = vrot.lane.b32.xlu0 %v2295_v16, %s2214_s21 }
 0x85f   :  { %v1046_v29 = vpop.xlane.xlu0 %1045 }
 0x860   :  { %2159 = vrcp.f32 %v1046_v29 }
 0x863   :  { %v1055_v31 = vpop.permute.xlu0 %1054 }
 0x864   :  { %2051 = vmatpush3.msra.mxu1 %v1055_v31 }
 0x865   :  { %2060 = vmatprep.subr.bf16.mxu1 %v2201_v1 }
 0x867   :  { %v1511_v33 = vpop.permute.xlu0 %1510 }
 0x868   :  { %2082 = vmatpush3.msra.mxu0 %v1511_v33 }
 0x869   :  { %2092 = vmatprep.subr.bf16.mxu0 %v2201_v1 }
 0x86a   :  { %v2160_v34 = vpop.eup %2159 }
 0x86b   :  { %v1051_v35 = vmul.f32 %v2160_v34, %v2158_v27 }
 0x86d   :  { %2053 = vmatmul.mubr.msk.f32.vlgmr.msra.gmra.mrb[14].mxu1 %vm121_vm2, %v1051_v35  ;;  %v1202_v37 = vpop.f32.mrb[18].mxu0 }
 0x86e   :  { %v2059_v38 = vpop.f32.mrb[19].mxu0  ;;  %2062 = vmatprep.mubr.msk.bf16.mxu1 %vm2202_vm0, %v2201_v1  ;;  %2061 = vmatpush3.bf16.msra.mxu1 %v1211_v47 }
 0x86f   :  { %2076 = vmatprep.subr.mxu1 %v2201_v1 }
 0x871   :  { %v1330_v16 = vpop.f32.mrb[20].mxu0 }
 0x872   :  { %v1331_v39 = vadd.f32 %v1330_v16, %v2323_v25  ;;  %v2070_v40 = vpop.f32.mrb[21].mxu0  ;;  %v1922_v16 = vcombine.low %v2466_v46, %v33_v20  ;;  %v2133_v46 = vld [vmem:[%s2559_s4] sm:$0xff]  }
 0x874   :  { %v1412_v41 = vsel %vm121_vm2, %v1331_v39, -inf }
 0x875   :  { %1413 = vmax.xlane.f32.xlu1 %v1412_v41  ;;  %v1408_v42 = vpop.f32.mrb[22].mxu0 }
 0x876   :  { %v1409_v43 = vadd.f32 %v1408_v42, %v2326_v30  ;;  %v2075_v44 = vpop.f32.mrb[23].mxu0 }
 0x878   :  { %v1415_v45 = vsel %vm121_vm2, %v1409_v43, -inf }
 0x879   :  { %1416 = vmax.xlane.f32.xlu1 %v1415_v45 }
 0x902   :  { %v1414_v25 = vpop.xlane.xlu1 %1413 }
 0x903   :  { %v1418_v48 = vsub.f32 %v1331_v39, %v1414_v25  ;;  %v1921_v25 = vcombine.low %v2389_v36, %v2381_v32 }
 0x905   :  { %v1420_v49 = vmul.f32 1.442695, %v1418_v48  ;;  %v2134_v48 = vld [vmem:[%s2559_s4 + $0x8] sm:$0xff]  }
 0x906   :  { %v1417_v50 = vpop.xlane.xlu1 %1416 }
 0x907   :  { %2161 = vpow2.f32 %v1420_v49  ;;  %v1419_v30 = vsub.f32 %v1409_v43, %v1417_v50 }
 0x909   :  { %v1422_v51 = vmul.f32 1.442695, %v1419_v30 }
 0x90b   :  { %2163 = vpow2.f32 %v1422_v51 }
 0x911   :  { %v2162_v52 = vpop.eup %2161 }
 0x912   :  { %v1424_v53 = vsel %vm121_vm2, %v2162_v52, 0.0 }
 0x913   :  { %1425 = vadd.xlane.f32.xlu1 %v1424_v53 }
 0x915   :  { %v2164_v54 = vpop.eup %2163 }
 0x916   :  { %v1427_v55 = vsel %vm121_vm2, %v2164_v54, 0.0 }
 0x917   :  { %1428 = vadd.xlane.f32.xlu1 %v1427_v55 }
 0x928   :  { %1434 = vrot.lane.b32.xlu1 %v2291_v12, %s2214_s21 }
 0x940   :  { %v1126_v56 = vpop.f32.mrb[14].mxu1 }
 0x941   :  { %v1206_v57 = vpack.c.bf16 %v1202_v37, %v1126_v56  ;;  %v2054_v58 = vpop.f32.mrb[15].mxu1 }
 0x942   :  { %v1679_v58 = vsub.s32 3, %v2282_v7 }
 0x943   :  { %2063 = vmatmul.mubr.msk.bf16.vlgmr.msra.gmra.mrb[16].mxu1 %vm121_vm2, %v1206_v57 }
 0x944   :  { %2078 = vmatprep.mubr.msk.f32.mxu1 %vm2202_vm0, %v2201_v1 }
 0x9a0   :  { %v1426_v59 = vpop.xlane.xlu1 %1425 }
 0x9a1   :  { %2165 = vrcp.f32 %v1426_v59 }
 0x9a4   :  { %v1429_v60 = vpop.xlane.xlu1 %1428 }
 0x9a5   :  { %2167 = vrcp.f32 %v1429_v60 }
 0x9a8   :  { %v1435_v61 = vpop.permute.xlu1 %1434 }
 0x9a9   :  { %2077 = vmatpush3.msra.mxu1 %v1435_v61 }
 0x9aa   :  { %2086 = vmatprep.subr.bf16.mxu1 %v2201_v1 }
 0x9ab   :  { %v2166_v62 = vpop.eup %2165 }
 0x9ac   :  { %v1431_v63 = vmul.f32 %v2166_v62, %v2162_v52  ;;  %v1680_v62 = vrot.slane %v2288_v9, %v1679_v58 }
 0x9ae   :  { %2079 = vmatmul.mubr.msk.f32.vlgmr.msra.gmra.mrb[20].mxu1 %vm121_vm2, %v1431_v63 }
 0x9af   :  { %v2168_v12 = vpop.eup %2167  ;;  %2088 = vmatprep.mubr.msk.bf16.mxu1 %vm2202_vm0, %v2201_v1  ;;  %2087 = vmatpush3.bf16.msra.mxu1 %v1591_v5  ;;  %v2135_v5 = vld [vmem:[%s2559_s4 + $0x10] sm:$0xff]  }
 0x9b0   :  { %v1433_v18 = vmul.f32 %v2168_v12, %v2164_v54  ;;  %2100 = vmatprep.subr.bf16.mxu1 %v2201_v1  ;;  %v1673_v54 = vsub.s32 2, %v2282_v7 }
 0x9b2   :  { %2084 = vmatmul.mubr.msk.f32.vlgmr.msra.gmra.mrb[24].mxu0 %vm121_vm2, %v1433_v18  ;;  %v1674_v56 = vrot.slane %v2288_v9, %v1673_v54 }
 0x9b3   :  { %2096 = vmatprep.mubr.msk.bf16.mxu0 %vm2202_vm0, %v2201_v1 }
 0xa16   :  { %v1247_v6 = vpop.f32.mrb[16].mxu1 }
 0xa17   :  { %v1254_v8 = vadd.f32 %v1247_v6, %v2430_v0  ;;  %v2064_v10 = vpop.f32.mrb[17].mxu1  ;;  %v2136_v6 = vld [vmem:[%s2559_s4 + $0x18] sm:$0xff]   ;;  %s2215_s4 = smov [#allocation2]  }
 0xa18   :  { %v1250_v11 = vpop.f32.mrb[18].mxu1  ;;  %s1879_s30 = sshll.u32 %s2215_s4, 4  ;;  %s1880_s30 = int_to_ptr.vmem [resolvable:$true] %s1879_s30 }
 0xa19   :  { %v1255_v13 = vadd.f32 %v1250_v11, %v2432_v2  ;;  %v2065_v14 = vpop.f32.mrb[19].mxu1  ;;  %s2177_s7 = scalar_lea.vmem %s1880_s30, 256  ;;  %p2182_p1 = scmp.lt.s32.totalorder %s1880_s30, %s1880_s30 }
 0xa1a   :  { %p2178_p0 = scmp.ne.s32.totalorder %s1880_s30, %s2177_s7  ;;  %p2183_p2 = scmp.lt.s32.totalorder %s2177_s7, %s2177_s7 }
 0xa1c   :  { %p2184_p3 = por %p2183_p2, %p2182_p1 }
 0xa1e   :  { %p2185_p4 = pnand %p2184_p3, %p2178_p0 }
 0xa81   :  { %v1506_v15 = vpop.f32.mrb[20].mxu1 }
 0xa82   :  { %v2080_v17 = vpop.f32.mrb[21].mxu1 }
 0xa85   :  { %v1582_v19 = vpop.f32.mrb[24].mxu0 }
 0xa86   :  { %v1586_v21 = vpack.c.bf16 %v1582_v19, %v1506_v15  ;;  %v2085_v22 = vpop.f32.mrb[25].mxu0 }
 0xa88   :  { %2089 = vmatmul.mubr.msk.bf16.vlgmr.msra.gmra.mrb[24].mxu1 %vm121_vm2, %v1586_v21 }
 0xa89   :  { %2108 = vmatprep.mubr.msk.bf16.mxu1 %vm2202_vm0, %v2201_v1  ;;  %2101 = vmatpush3.bf16.msra.mxu1 %v2133_v46 }
 0xa8a   :  { %2102 = vmatprep.subr.bf16.mxu1 %v2201_v1 }
 0xa8d   :  { %2103 = vmatpush3.bf16.msra.mxu1 %v2134_v48 }
 0xa8e   :  { %2104 = vmatprep.subr.bf16.mxu1 %v2201_v1 }
 0xa91   :  { %2105 = vmatpush3.bf16.msra.mxu1 %v2135_v5 }
 0xa92   :  { %2106 = vmatprep.subr.bf16.mxu1 %v2201_v1 }
 0xa95   :  { %2107 = vmatpush3.bf16.msra.mxu1 %v2136_v6 }
 0xb5b   :  { %v1627_v0 = vpop.f32.mrb[24].mxu1 }
 0xb5c   :  { %v1634_v26 = vadd.f32 %v1627_v0, %v1254_v8  ;;  %v2090_v27 = vpop.f32.mrb[25].mxu1  ;;  %v1686_v8 = vsub.s32 4, %v2282_v7 }
 0xb5d   :  { %v1630_v28 = vpop.f32.mrb[26].mxu1 }
 0xb5e   :  { %v1640_v2 = vadd.f32 %v1639_v24, %v1634_v26  ;;  %v1635_v29 = vadd.f32 %v1630_v28, %v1255_v13  ;;  %v2091_v31 = vpop.f32.mrb[27].mxu1  ;;  %v1687_v10 = vrot.slane %v2288_v9, %v1686_v8 }
 0xb60   :  { %v1641_v33 = vadd.f32 %v1639_v24, %v1635_v29  ;;  %v1642_v34 = vadd.f32 %v1640_v2, %v2266_v3 }
 0xb62   :  { %v1644_v35 = vsel %vm55_vm1, %v1642_v34, 0.0  ;;  %v1643_v37 = vadd.f32 %v1641_v33, %v2271_v4 }
 0xb63   :  { %1645 = vadd.xlane.f32.xlu0 %v1644_v35 }
 0xb64   :  { %v1647_v38 = vsel %vm55_vm1, %v1643_v37, 0.0 }
 0xb65   :  { %1648 = vadd.xlane.f32.xlu1 %v1647_v38 }
 0xb76   :  { %1700 = vrot.lane.b32.xlu1 %v1922_v16, %s2203_s29 }
 0xbf0   :  { %v1646_v39 = vpop.xlane.xlu0 %1645 }
 0xbf1   :  { %v1651_v40 = vmul.f32 0.03125, %v1646_v39 }
 0xbf2   :  { %v1649_v41 = vpop.xlane.xlu1 %1648 }
 0xbf3   :  { %v1653_v42 = vsub.f32 %v1642_v34, %v1651_v40  ;;  %v1652_v43 = vmul.f32 0.03125, %v1649_v41 }
 0xbf5   :  { %v1654_v44 = vsub.f32 %v1643_v37, %v1652_v43  ;;  %v1655_v45 = vmul.f32 %v1653_v42, %v1653_v42 }
 0xbf6   :  { %v1701_v53 = vpop.permute.xlu1 %1700 }
 0xbf7   :  { %v1657_v3 = vsel %vm55_vm1, %v1655_v45, 0.0  ;;  %v1656_v47 = vmul.f32 %v1654_v44, %v1654_v44 }
 0xbf8   :  { %1658 = vadd.xlane.f32.xlu0 %v1657_v3 }
 0xbf9   :  { %v1660_v4 = vsel %vm55_vm1, %v1656_v47, 0.0 }
 0xbfc   :  { %1661 = vadd.xlane.f32.xlu0 %v1660_v4 }
 0xc12   :  { %1698 = vrot.lane.b32.xlu0 %v1921_v25, %s2203_s29 }
 0xc85   :  { %v1659_v49 = vpop.xlane.xlu0 %1658 }
 0xc86   :  { %v1663_v50 = vmul.f32 0.03125, %v1659_v49  ;;  %v1862_v49 = vsub.s32 6, %v2282_v7 }
 0xc88   :  { %v1665_v30 = vadd.f32 1e-05, %v1663_v50  ;;  %v1868_v50 = vsub.s32 7, %v2282_v7 }
 0xc89   :  { %v1662_v32 = vpop.xlane.xlu0 %1661 }
 0xc8a   :  { %2169 = vrsqrt.f32 %v1665_v30  ;;  %v1664_v36 = vmul.f32 0.03125, %v1662_v32  ;;  %v1863_v30 = vrot.slane %v2288_v9, %v1862_v49 }
 0xc8c   :  { %v1666_v51 = vadd.f32 1e-05, %v1664_v36 }
 0xc8d   :  { %v1699_v52 = vpop.permute.xlu0 %1698 }
 0xc8e   :  { %2171 = vrsqrt.f32 %v1666_v51  ;;  %2093 = vmatpush3.bf16.msra.mxu0 %v1699_v52  ;;  %v1869_v51 = vrot.slane %v2288_v9, %v1868_v50 }
 0xc8f   :  { %2094 = vmatprep.subr.bf16.mxu0 %v2201_v1  ;;  %v1761_v1 = vsub.s32 5, %v2282_v7 }
 0xc91   :  { %v1762_v24 = vrot.slane %v2288_v9, %v1761_v1 }
 0xc92   :  { %2095 = vmatpush3.bf16.msra.mxu0 %v1701_v53 }
 0xc94   :  { %v2170_v55 = vpop.eup %2169 }
 0xc95   :  { %v1669_v57 = vmul.f32 %v2170_v55, %v1653_v42 }
 0xc97   :  { %v1675_v60 = vmul.f32 %v1674_v56, %v1669_v57 }
 0xc98   :  { %v2172_v59 = vpop.eup %2171 }
 0xc99   :  { %v1670_v61 = vmul.f32 %v2172_v59, %v1654_v44  ;;  %v1681_v12 = vadd.f32 %v1680_v62, %v1675_v60 }
 0xc9b   :  { %v1676_v63 = vmul.f32 %v1674_v56, %v1670_v61 }
 0xc9d   :  { %v1682_v18 = vadd.f32 %v1680_v62, %v1676_v63 }
 0xc9f   :  { %v1683_v20 = vpack.c.bf16 %v1682_v18, %v1681_v12 }
 0xca1   :  { %2097 = vmatmul.mubr.msk.bf16.vlgmr.msra.gmra.mrb[28].mxu0 %vm55_vm1, %v1683_v20 }
 0xd74   :  { %v1741_v11 = vpop.f32.mrb[28].mxu0 }
 0xd75   :  { %v1742_v13 = vadd.f32 %v1741_v11, %v1687_v10  ;;  %v2098_v14 = vpop.f32.mrb[29].mxu0 }
 0xd76   :  { %v1744_v15 = vpop.f32.mrb[30].mxu0 }
 0xd77   :  { %v1745_v17 = vadd.f32 %v1744_v15, %v1687_v10  ;;  %v2099_v19 = vpop.f32.mrb[31].mxu0  ;;  %v1748_v21 = vmax.f32 %v1742_v13, 0.0 }
 0xd79   :  { %v1749_v22 = vmax.f32 %v1745_v17, 0.0 }
 0xd7b   :  { %v1750_v23 = vpack.c.bf16 %v1749_v22, %v1748_v21 }
 0xd7d   :  { %2109 = vmatmul.mubr.msk.bf16.vlgmr.msra.gmra.mrb[28].mxu1 %vm1787_vm6, %v1750_v23 }
 0xe50   :  { %v1825_v0 = vpop.f32.mrb[28].mxu1 }
 0xe51   :  { %v1826_v26 = vadd.f32 %v1825_v0, %v1762_v24  ;;  %v2110_v27 = vpop.f32.mrb[29].mxu1 }
 0xe52   :  { %v1828_v28 = vpop.f32.mrb[30].mxu1 }
 0xe53   :  { %v1829_v2 = vadd.f32 %v1828_v28, %v1762_v24  ;;  %v2111_v29 = vpop.f32.mrb[31].mxu1  ;;  %v1832_v31 = vadd.f32 %v1826_v26, %v1681_v12 }
 0xe55   :  { %v1834_v33 = vsel %vm55_vm1, %v1832_v31, 0.0  ;;  %v1833_v34 = vadd.f32 %v1829_v2, %v1682_v18 }
 0xe56   :  { %1835 = vadd.xlane.f32.xlu0 %v1834_v33 }
 0xe57   :  { %v1837_v35 = vsel %vm55_vm1, %v1833_v34, 0.0 }
 0xe58   :  { %1838 = vadd.xlane.f32.xlu1 %v1837_v35 }
 0xee3   :  { %v1836_v37 = vpop.xlane.xlu0 %1835 }
 0xee4   :  { %v1840_v38 = vmul.f32 0.03125, %v1836_v37 }
 0xee5   :  { %v1839_v16 = vpop.xlane.xlu1 %1838 }
 0xee6   :  { %v1842_v39 = vsub.f32 %v1832_v31, %v1840_v38  ;;  %v1841_v40 = vmul.f32 0.03125, %v1839_v16 }
 0xee8   :  { %v1843_v41 = vsub.f32 %v1833_v34, %v1841_v40  ;;  %v1844_v42 = vmul.f32 %v1842_v39, %v1842_v39 }
 0xeea   :  { %v1846_v43 = vsel %vm55_vm1, %v1844_v42, 0.0  ;;  %v1845_v44 = vmul.f32 %v1843_v41, %v1843_v41 }
 0xeeb   :  { %1847 = vadd.xlane.f32.xlu0 %v1846_v43 }
 0xeec   :  { %v1849_v45 = vsel %vm55_vm1, %v1845_v44, 0.0 }
 0xeef   :  { %1850 = vadd.xlane.f32.xlu0 %v1849_v45 }
 0xf78   :  { %v1848_v3 = vpop.xlane.xlu0 %1847 }
 0xf79   :  { %v1852_v47 = vmul.f32 0.03125, %v1848_v3 }
 0xf7b   :  { %v1854_v4 = vadd.f32 1e-05, %v1852_v47 }
 0xf7c   :  { %v1851_v25 = vpop.xlane.xlu0 %1850 }
 0xf7d   :  { %2173 = vrsqrt.f32 %v1854_v4  ;;  %v1853_v46 = vmul.f32 0.03125, %v1851_v25 }
 0xf7f   :  { %v1855_v48 = vadd.f32 1e-05, %v1853_v46 }
 0xf81   :  { %2175 = vrsqrt.f32 %v1855_v48 }
 0xf87   :  { %v2174_v32 = vpop.eup %2173 }
 0xf88   :  { %v1858_v36 = vmul.f32 %v2174_v32, %v1842_v39 }
 0xf8a   :  { %v1864_v52 = vmul.f32 %v1863_v30, %v1858_v36 }
 0xf8b   :  { %v2176_v53 = vpop.eup %2175 }
 0xf8c   :  { %v1859_v54 = vmul.f32 %v2176_v53, %v1843_v41  ;;  %v1870_v55 = vadd.f32 %v1869_v51, %v1864_v52 }
 0xf8e   :  { %v1865_v56 = vmul.f32 %v1863_v30, %v1859_v54  ;;  %1872 = vst.msk [vmem:[#allocation2] sm:$0xff] %vm55_vm1, %v1870_v55 }
 0xf90   :  { %v1871_v57 = vadd.f32 %v1869_v51, %v1865_v56 }
 0xf92   :  { %1873 = vst.msk [vmem:[#allocation2 + $0x8] sm:$0xff] %vm55_vm1, %v1871_v57 }
 0xf93   :  { %2188 = shalt.err (!%p2185_p4)
}
 0xf94   :  { %s2189_s9 = scalar_lea.hbm %s2561_s6, 256 }
 0xf95   :  { %p2190_p5 = scmp.ne.s32.totalorder %s2561_s6, %s2189_s9  ;;  %p2193_p6 = scmp.lt.u32.totalorder %s2189_s9, %s2561_s6 }
 0xf97   :  { %p2195_p7 = pnand %p2193_p6, %p2190_p5 }
 0xf99   :  { %2198 = shalt.err (!%p2195_p7)
}
 0xf9a   :  { %s2216_s14 = smov 128   ;;  %s2217_s15 = smov 8  }
 0xf9b   :  { %1885 = dma.vmem_to_hbm [thread:$0]  %s1880_s30, 256, %s2561_s6, [#allocation3], %s2216_s14, %s2216_s14, %s2217_s15  }
 0xf9c   :  { %2199 = dma.done.wait [#allocation3], 256  }
 0xf9d   :  { %2200 = vsyncadd [#allocation3], 4294967040 }
 0xf9e   :  { %1889 = vsyncpa [#allocation3], 1 }

</bundles_post_ra>
